<compile_context>
chip_gen: v7x
topology: tpu7x:2x2x1
jax: 0.10.0
libtpu: 0.0.40
codegen_flags: <defaults>
</compile_context>

<pallas_src>
import functools

import jax
import jax.numpy as jnp
from jax.experimental import pallas as pl
from jax.experimental.pallas import tpu as pltpu


def _attn_block_kernel(x_ref, gamma_ref, beta_ref, wqkv_ref, bqkv_ref,
                       wp_ref, bp_ref, o_ref, q_sc, k_sc, v_sc,
                       *, n_heads, emb_dim, head_dim, q_tile, eps):
    qi = pl.program_id(1)

    # ---- once per batch element: LayerNorm + fused QKV projection ----------
    @pl.when(qi == 0)
    def _project_qkv():
        x = x_ref[0]                                       # (L, E) f32
        mean = jnp.mean(x, axis=-1, keepdims=True)
        xc = x - mean
        var = jnp.mean(xc * xc, axis=-1, keepdims=True)
        h = (xc * jax.lax.rsqrt(var + eps)) * gamma_ref[0] + beta_ref[0]

        # One wide MXU matmul (N = 3E); bf16 inputs, f32 accumulation.
        # Q columns of wqkv/bqkv are pre-scaled by emb_dim ** -0.5.
        qkv = jnp.dot(h.astype(jnp.bfloat16), wqkv_ref[...],
                      preferred_element_type=jnp.float32) + bqkv_ref[0]   # (L, 3E)

        # Scatter into head-major (H, L, Dh) scratch -- one-time relayout per
        # batch element; the attention path then only touches lane-dense blocks.
        for hd in range(n_heads):
            q_lo = hd * head_dim
            k_lo = emb_dim + hd * head_dim
            v_lo = 2 * emb_dim + hd * head_dim
            q_sc[hd] = qkv[:, q_lo:q_lo + head_dim].astype(jnp.bfloat16)
            k_sc[hd] = qkv[:, k_lo:k_lo + head_dim].astype(jnp.bfloat16)
            v_sc[hd] = qkv[:, v_lo:v_lo + head_dim].astype(jnp.bfloat16)

    # ---- every query tile: batched-head attention + output projection ------
    start = pl.multiple_of(qi * q_tile, q_tile)
    q = q_sc[:, pl.ds(start, q_tile), :]                   # (H, TQ, Dh) bf16 (pre-scaled)
    k = k_sc[...]                                          # (H, L, Dh)  bf16
    v = v_sc[...]                                          # (H, L, Dh)  bf16

    s = jnp.einsum("hqd,hkd->hqk", q, k,
                   preferred_element_type=jnp.float32)     # (H, TQ, L) f32
    s = s - jnp.max(s, axis=-1, keepdims=True)
    p = jnp.exp(s)
    p = p * pl.reciprocal(jnp.sum(p, axis=-1, keepdims=True), approx=True)
    o = jnp.einsum("hqk,hkd->hqd", p.astype(jnp.bfloat16), v,
                   preferred_element_type=jnp.float32)     # (H, TQ, Dh) f32

    # proj_out(concat_h o_h) == sum_h o_h @ Wp[h*Dh:(h+1)*Dh, :]
    out = jnp.dot(o[0].astype(jnp.bfloat16), wp_ref[0],
                  preferred_element_type=jnp.float32)
    for hd in range(1, n_heads):
        out = out + jnp.dot(o[hd].astype(jnp.bfloat16), wp_ref[hd],
                            preferred_element_type=jnp.float32)
    out = out + bp_ref[0]
    o_ref[0] = out.astype(o_ref.dtype)                     # lane-dense (TQ, E) store


def _pick_q_tile(seq_len, emb_dim):
    # Query tiling requires TQ % 8 == 0 and E % 128 == 0 (Mosaic (8,128) rule);
    # otherwise the whole sequence is a single tile (block == full array).
    if emb_dim % 128 != 0 or seq_len <= 512:
        return seq_len
    for tq in (512, 256, 128, 64, 32, 16, 8):
        if seq_len % tq == 0:
            return tq
    return seq_len


def attn_block_pallas(x, params, *, n_heads):
    """x: (B, L, E) float32; params: dict of weights (see init_params)."""
    B, L, E = x.shape
    assert E % n_heads == 0
    Dh = E // n_heads
    TQ = _pick_q_tile(L, E)
    num_q_tiles = L // TQ

    # NOTE: the PyTorch module scales scores by emb_dim ** -0.5 (not
    # head_size ** -0.5).  Fold that scale into the Q weight & bias (free).
    scale = float(E) ** (-0.5)
    wqkv = jnp.concatenate(
        [params["wq"] * scale, params["wk"], params["wv"]], axis=1
    ).astype(jnp.bfloat16)                                          # (E, 3E) bf16
    bqkv = jnp.concatenate(
        [params["bq"] * scale, params["bk"], params["bv"]], axis=1)  # (1, 3E) f32
    wp = params["wp"].reshape(n_heads, Dh, E).astype(jnp.bfloat16)   # (H, Dh, E) bf16

    kernel = functools.partial(
        _attn_block_kernel, n_heads=n_heads, emb_dim=E, head_dim=Dh,
        q_tile=TQ, eps=1e-5)

    in_specs = [
        pl.BlockSpec((1, L, E), lambda b, qi: (b, 0, 0)),            # x (full seq / batch)
        pl.BlockSpec((1, E), lambda b, qi: (0, 0)),                  # gamma
        pl.BlockSpec((1, E), lambda b, qi: (0, 0)),                  # beta
        pl.BlockSpec((E, 3 * E), lambda b, qi: (0, 0)),              # Wqkv (bf16)
        pl.BlockSpec((1, 3 * E), lambda b, qi: (0, 0)),              # bqkv
        pl.BlockSpec((n_heads, Dh, E), lambda b, qi: (0, 0, 0)),     # Wp head-blocked (bf16)
        pl.BlockSpec((1, E), lambda b, qi: (0, 0)),                  # bp
    ]
    out_spec = pl.BlockSpec((1, TQ, E), lambda b, qi: (b, qi, 0))

    return pl.pallas_call(
        kernel,
        out_shape=jax.ShapeDtypeStruct((B, L, E), jnp.float32),
        grid_spec=pltpu.PrefetchScalarGridSpec(
            num_scalar_prefetch=0,
            grid=(B, num_q_tiles),
            in_specs=in_specs,
            out_specs=out_spec,
            scratch_shapes=[
                pltpu.VMEM((n_heads, L, Dh), jnp.bfloat16),   # q (pre-scaled)
                pltpu.VMEM((n_heads, L, Dh), jnp.bfloat16),   # k
                pltpu.VMEM((n_heads, L, Dh), jnp.bfloat16),   # v
            ]),
        compiler_params=pltpu.CompilerParams(
            # q/k/v scratch is carried across query tiles -> inner axis must be
            # sequential; the batch axis shards across TensorCores (megacore).
            dimension_semantics=("parallel", "arbitrary"),
            vmem_limit_bytes=64 * 1024 * 1024),
    )(x, params["gamma"], params["beta"], wqkv, bqkv, wp, params["bp"])


def init_params(key, emb_dim):
    """Deterministic synthetic parameters (shapes match the PyTorch module)."""
    ks = jax.random.split(key, 8)
    def lin(kw, kb):
        w = jax.random.normal(kw, (emb_dim, emb_dim), jnp.float32) * 0.02
        b = jax.random.normal(kb, (1, emb_dim), jnp.float32) * 0.02
        return w, b
    wq, bq = lin(ks[0], ks[1])
    wk, bk = lin(ks[2], ks[3])
    wv, bv = lin(ks[4], ks[5])
    wp, bp = lin(ks[6], ks[7])
    gamma = jnp.ones((1, emb_dim), jnp.float32)
    beta = jnp.zeros((1, emb_dim), jnp.float32)
    return dict(gamma=gamma, beta=beta, wq=wq, bq=bq, wk=wk, bk=bk,
                wv=wv, bv=bv, wp=wp, bp=bp)


def attn_block_reference(x, params, *, n_heads):
    """Pure-JAX f32 reference mirroring the PyTorch forward (eval, no mask)."""
    B, L, E = x.shape
    Dh = E // n_heads
    mean = jnp.mean(x, axis=-1, keepdims=True)
    var = jnp.mean((x - mean) ** 2, axis=-1, keepdims=True)
    h = (x - mean) * jax.lax.rsqrt(var + 1e-5) * params["gamma"][0] + params["beta"][0]
    q = h @ params["wq"] + params["bq"][0]
    k = h @ params["wk"] + params["bk"][0]
    v = h @ params["wv"] + params["bv"][0]
    reshape_heads = lambda t: t.reshape(B, L, n_heads, Dh).transpose(0, 2, 1, 3)
    q, k, v = map(reshape_heads, (q, k, v))
    w = jnp.einsum("bhld,bhmd->bhlm", q, k) * (float(E) ** -0.5)
    w = jax.nn.softmax(w, axis=-1)
    o = jnp.einsum("bhlm,bhmd->bhld", w, v)
    o = o.transpose(0, 2, 1, 3).reshape(B, L, E)
    return o @ params["wp"] + params["bp"][0]


if __name__ == "__main__":
    B, L, E, H = 2, 8, 32, 2   # batch, seq len (block_size), emb_dim, n_heads
    key = jax.random.PRNGKey(0)
    kx, kp = jax.random.split(key)
    x = jax.random.normal(kx, (B, L, E), jnp.float32)
    params = init_params(kp, E)

    out = attn_block_pallas(x, params, n_heads=H)
    out = jax.block_until_ready(out)

    ref = attn_block_reference(x, params, n_heads=H)
    assert out.shape == (B, L, E)
    # bf16 MXU inputs (f32 accumulation) -> compare with a bf16-appropriate tol.
    assert jnp.allclose(out, ref, atol=5e-3, rtol=5e-2), "mismatch vs reference"

    print("KERNEL_OK")
</pallas_src>

<mosaic_0001>
module attributes {stable_mosaic.version = 11 : i64} {
  func.func @_attn_block_kernel(%arg0: i32, %arg1: i32, %arg2: memref<1x8x32xf32, #tpu.memory_space<vmem>>, %arg3: memref<1x32xf32, #tpu.memory_space<vmem>>, %arg4: memref<1x32xf32, #tpu.memory_space<vmem>>, %arg5: memref<32x96xbf16, #tpu.memory_space<vmem>>, %arg6: memref<1x96xf32, #tpu.memory_space<vmem>>, %arg7: memref<2x16x32xbf16, #tpu.memory_space<vmem>>, %arg8: memref<1x32xf32, #tpu.memory_space<vmem>>, %arg9: memref<1x8x32xf32, #tpu.memory_space<vmem>>, %arg10: memref<2x8x16xbf16, #tpu.memory_space<vmem>>, %arg11: memref<2x8x16xbf16, #tpu.memory_space<vmem>>, %arg12: memref<2x8x16xbf16, #tpu.memory_space<vmem>>) attributes {dimension_semantics = [#tpu.dimension_semantics<parallel>, #tpu.dimension_semantics<arbitrary>], iteration_bounds = array<i64: 2, 1>, scalar_prefetch = 0 : i64, scratch_operands = 3 : i64, tpu.core_type = #tpu.core_type<tc>, window_params = [{transform_indices = @transform_0, window_bounds = array<i64: 1, 8, 32>}, {pipeline_mode = #tpu.pipeline_mode<synchronous>, transform_indices = @transform_1, window_bounds = array<i64: 1, 32>}, {pipeline_mode = #tpu.pipeline_mode<synchronous>, transform_indices = @transform_2, window_bounds = array<i64: 1, 32>}, {pipeline_mode = #tpu.pipeline_mode<synchronous>, transform_indices = @transform_3, window_bounds = array<i64: 32, 96>}, {pipeline_mode = #tpu.pipeline_mode<synchronous>, transform_indices = @transform_4, window_bounds = array<i64: 1, 96>}, {pipeline_mode = #tpu.pipeline_mode<synchronous>, transform_indices = @transform_5, window_bounds = array<i64: 2, 16, 32>}, {pipeline_mode = #tpu.pipeline_mode<synchronous>, transform_indices = @transform_6, window_bounds = array<i64: 1, 32>}, {transform_indices = @transform_7, window_bounds = array<i64: 1, 8, 32>}]} {
    %c0_i32 = arith.constant 0 : i32
    %0 = arith.cmpi eq, %arg1, %c0_i32 : i32
    %1 = arith.extui %0 : i1 to i32
    %c0_i32_0 = arith.constant 0 : i32
    %2 = arith.cmpi ne, %1, %c0_i32_0 : i32
    scf.if %2 {
      %c0_23 = arith.constant 0 : index
      %c0_24 = arith.constant 0 : index
      %c0_25 = arith.constant 0 : index
      %43 = vector.load %arg2[%c0_23, %c0_24, %c0_25] : memref<1x8x32xf32, #tpu.memory_space<vmem>>, vector<1x8x32xf32>
      %44 = vector.shape_cast %43 : vector<1x8x32xf32> to vector<8x32xf32>
      %cst_26 = arith.constant dense<0.000000e+00> : vector<8xf32>
      %45 = vector.multi_reduction <add>, %44, %cst_26 [1] : vector<8x32xf32> to vector<8xf32>
      %46 = vector.shape_cast %45 : vector<8xf32> to vector<8x1xf32>
      %cst_27 = arith.constant 3.200000e+01 : f32
      %47 = vector.broadcast %cst_27 : f32 to vector<8x1xf32>
      %48 = arith.divf %46, %47 : vector<8x1xf32>
      %49 = vector.broadcast %48 : vector<8x1xf32> to vector<8x32xf32>
      %50 = arith.subf %44, %49 : vector<8x32xf32>
      %51 = arith.mulf %50, %50 : vector<8x32xf32>
      %cst_28 = arith.constant dense<0.000000e+00> : vector<8xf32>
      %52 = vector.multi_reduction <add>, %51, %cst_28 [1] : vector<8x32xf32> to vector<8xf32>
      %53 = vector.shape_cast %52 : vector<8xf32> to vector<8x1xf32>
      %cst_29 = arith.constant 3.200000e+01 : f32
      %54 = vector.broadcast %cst_29 : f32 to vector<8x1xf32>
      %55 = arith.divf %53, %54 : vector<8x1xf32>
      %cst_30 = arith.constant 9.99999974E-6 : f32
      %56 = vector.broadcast %cst_30 : f32 to vector<8x1xf32>
      %57 = arith.addf %55, %56 : vector<8x1xf32>
      %58 = math.rsqrt %57 : vector<8x1xf32>
      %59 = vector.broadcast %58 : vector<8x1xf32> to vector<8x32xf32>
      %60 = arith.mulf %50, %59 : vector<8x32xf32>
      %c0_31 = arith.constant 0 : index
      %c0_32 = arith.constant 0 : index
      %61 = vector.load %arg3[%c0_31, %c0_32] : memref<1x32xf32, #tpu.memory_space<vmem>>, vector<1x32xf32>
      %62 = vector.shape_cast %61 : vector<1x32xf32> to vector<32xf32>
      %63 = vector.shape_cast %62 : vector<32xf32> to vector<1x32xf32>
      %64 = vector.broadcast %63 : vector<1x32xf32> to vector<8x32xf32>
      %65 = arith.mulf %60, %64 : vector<8x32xf32>
      %c0_33 = arith.constant 0 : index
      %c0_34 = arith.constant 0 : index
      %66 = vector.load %arg4[%c0_33, %c0_34] : memref<1x32xf32, #tpu.memory_space<vmem>>, vector<1x32xf32>
      %67 = vector.shape_cast %66 : vector<1x32xf32> to vector<32xf32>
      %68 = vector.shape_cast %67 : vector<32xf32> to vector<1x32xf32>
      %69 = vector.broadcast %68 : vector<1x32xf32> to vector<8x32xf32>
      %70 = arith.addf %65, %69 : vector<8x32xf32>
      %71 = arith.truncf %70 : vector<8x32xf32> to vector<8x32xbf16>
      %c0_35 = arith.constant 0 : index
      %c0_36 = arith.constant 0 : index
      %72 = vector.load %arg5[%c0_35, %c0_36] : memref<32x96xbf16, #tpu.memory_space<vmem>>, vector<32x96xbf16>
      %cst_37 = arith.constant dense<0.000000e+00> : vector<8x96xf32>
      %73 = tpu.matmul %71, %72, %cst_37 {dimension_numbers = #tpu.dot_dimension_numbers<[1], [0], [0], [1], [0, 0, 1, 1], [], []>} : vector<8x32xbf16>, vector<32x96xbf16>, vector<8x96xf32> -> vector<8x96xf32>
      %c0_38 = arith.constant 0 : index
      %c0_39 = arith.constant 0 : index
      %74 = vector.load %arg6[%c0_38, %c0_39] : memref<1x96xf32, #tpu.memory_space<vmem>>, vector<1x96xf32>
      %75 = vector.shape_cast %74 : vector<1x96xf32> to vector<96xf32>
      %76 = vector.shape_cast %75 : vector<96xf32> to vector<1x96xf32>
      %77 = vector.broadcast %76 : vector<1x96xf32> to vector<8x96xf32>
      %78 = arith.addf %73, %77 : vector<8x96xf32>
      %79 = vector.extract_strided_slice %78 {offsets = [0, 0], sizes = [8, 16], strides = [1, 1]} : vector<8x96xf32> to vector<8x16xf32>
      %80 = arith.truncf %79 : vector<8x16xf32> to vector<8x16xbf16>
      %c0_40 = arith.constant 0 : index
      %c0_41 = arith.constant 0 : index
      %c0_42 = arith.constant 0 : index
      %81 = vector.load %arg10[%c0_40, %c0_41, %c0_42] : memref<2x8x16xbf16, #tpu.memory_space<vmem>>, vector<1x8x16xbf16>
      %82 = vector.shape_cast %81 : vector<1x8x16xbf16> to vector<8x16xbf16>
      %83 = vector.shape_cast %80 : vector<8x16xbf16> to vector<1x8x16xbf16>
      tpu.vector_store %arg10[%c0_40, %c0_41, %c0_42], %83 {strides = array<i32>} : memref<2x8x16xbf16, #tpu.memory_space<vmem>>, vector<1x8x16xbf16>,
      %84 = vector.extract_strided_slice %78 {offsets = [0, 32], sizes = [8, 16], strides = [1, 1]} : vector<8x96xf32> to vector<8x16xf32>
      %85 = arith.truncf %84 : vector<8x16xf32> to vector<8x16xbf16>
      %c0_43 = arith.constant 0 : index
      %c0_44 = arith.constant 0 : index
      %c0_45 = arith.constant 0 : index
      %86 = vector.load %arg11[%c0_43, %c0_44, %c0_45] : memref<2x8x16xbf16, #tpu.memory_space<vmem>>, vector<1x8x16xbf16>
      %87 = vector.shape_cast %86 : vector<1x8x16xbf16> to vector<8x16xbf16>
      %88 = vector.shape_cast %85 : vector<8x16xbf16> to vector<1x8x16xbf16>
      tpu.vector_store %arg11[%c0_43, %c0_44, %c0_45], %88 {strides = array<i32>} : memref<2x8x16xbf16, #tpu.memory_space<vmem>>, vector<1x8x16xbf16>,
      %89 = vector.extract_strided_slice %78 {offsets = [0, 64], sizes = [8, 16], strides = [1, 1]} : vector<8x96xf32> to vector<8x16xf32>
      %90 = arith.truncf %89 : vector<8x16xf32> to vector<8x16xbf16>
      %c0_46 = arith.constant 0 : index
      %c0_47 = arith.constant 0 : index
      %c0_48 = arith.constant 0 : index
      %91 = vector.load %arg12[%c0_46, %c0_47, %c0_48] : memref<2x8x16xbf16, #tpu.memory_space<vmem>>, vector<1x8x16xbf16>
      %92 = vector.shape_cast %91 : vector<1x8x16xbf16> to vector<8x16xbf16>
      %93 = vector.shape_cast %90 : vector<8x16xbf16> to vector<1x8x16xbf16>
      tpu.vector_store %arg12[%c0_46, %c0_47, %c0_48], %93 {strides = array<i32>} : memref<2x8x16xbf16, #tpu.memory_space<vmem>>, vector<1x8x16xbf16>,
      %94 = vector.extract_strided_slice %78 {offsets = [0, 16], sizes = [8, 16], strides = [1, 1]} : vector<8x96xf32> to vector<8x16xf32>
      %95 = arith.truncf %94 : vector<8x16xf32> to vector<8x16xbf16>
      %c1_49 = arith.constant 1 : index
      %c0_50 = arith.constant 0 : index
      %c0_51 = arith.constant 0 : index
      %96 = vector.load %arg10[%c1_49, %c0_50, %c0_51] : memref<2x8x16xbf16, #tpu.memory_space<vmem>>, vector<1x8x16xbf16>
      %97 = vector.shape_cast %96 : vector<1x8x16xbf16> to vector<8x16xbf16>
      %98 = vector.shape_cast %95 : vector<8x16xbf16> to vector<1x8x16xbf16>
      tpu.vector_store %arg10[%c1_49, %c0_50, %c0_51], %98 {strides = array<i32>} : memref<2x8x16xbf16, #tpu.memory_space<vmem>>, vector<1x8x16xbf16>,
      %99 = vector.extract_strided_slice %78 {offsets = [0, 48], sizes = [8, 16], strides = [1, 1]} : vector<8x96xf32> to vector<8x16xf32>
      %100 = arith.truncf %99 : vector<8x16xf32> to vector<8x16xbf16>
      %c1_52 = arith.constant 1 : index
      %c0_53 = arith.constant 0 : index
      %c0_54 = arith.constant 0 : index
      %101 = vector.load %arg11[%c1_52, %c0_53, %c0_54] : memref<2x8x16xbf16, #tpu.memory_space<vmem>>, vector<1x8x16xbf16>
      %102 = vector.shape_cast %101 : vector<1x8x16xbf16> to vector<8x16xbf16>
      %103 = vector.shape_cast %100 : vector<8x16xbf16> to vector<1x8x16xbf16>
      tpu.vector_store %arg11[%c1_52, %c0_53, %c0_54], %103 {strides = array<i32>} : memref<2x8x16xbf16, #tpu.memory_space<vmem>>, vector<1x8x16xbf16>,
      %104 = vector.extract_strided_slice %78 {offsets = [0, 80], sizes = [8, 16], strides = [1, 1]} : vector<8x96xf32> to vector<8x16xf32>
      %105 = arith.truncf %104 : vector<8x16xf32> to vector<8x16xbf16>
      %c1_55 = arith.constant 1 : index
      %c0_56 = arith.constant 0 : index
      %c0_57 = arith.constant 0 : index
      %106 = vector.load %arg12[%c1_55, %c0_56, %c0_57] : memref<2x8x16xbf16, #tpu.memory_space<vmem>>, vector<1x8x16xbf16>
      %107 = vector.shape_cast %106 : vector<1x8x16xbf16> to vector<8x16xbf16>
      %108 = vector.shape_cast %105 : vector<8x16xbf16> to vector<1x8x16xbf16>
      tpu.vector_store %arg12[%c1_55, %c0_56, %c0_57], %108 {strides = array<i32>} : memref<2x8x16xbf16, #tpu.memory_space<vmem>>, vector<1x8x16xbf16>,
    } else {
    }
    %c8_i32 = arith.constant 8 : i32
    %3 = arith.muli %arg1, %c8_i32 : i32
    %4 = tpu.assume_multiple %3, 8 : i32
    %c0 = arith.constant 0 : index
    %5 = arith.index_cast %4 : i32 to index
    %c0_1 = arith.constant 0 : index
    %6 = vector.load %arg10[%c0, %5, %c0_1] : memref<2x8x16xbf16, #tpu.memory_space<vmem>>, vector<2x8x16xbf16>
    %c0_2 = arith.constant 0 : index
    %c0_3 = arith.constant 0 : index
    %c0_4 = arith.constant 0 : index
    %7 = vector.load %arg11[%c0_2, %c0_3, %c0_4] : memref<2x8x16xbf16, #tpu.memory_space<vmem>>, vector<2x8x16xbf16>
    %c0_5 = arith.constant 0 : index
    %c0_6 = arith.constant 0 : index
    %c0_7 = arith.constant 0 : index
    %8 = vector.load %arg12[%c0_5, %c0_6, %c0_7] : memref<2x8x16xbf16, #tpu.memory_space<vmem>>, vector<2x8x16xbf16>
    "tpu.trace_start"() <{level = 10 : i32, message = "hqd,hkd->hqk"}> : () -> ()
    %cst = arith.constant dense<0.000000e+00> : vector<2x8x8xf32>
    %9 = tpu.matmul %6, %7, %cst {dimension_numbers = #tpu.dot_dimension_numbers<[2], [2], [1], [1], [0, 0, 0, 1, 1, 1], [0], [0]>} : vector<2x8x16xbf16>, vector<2x8x16xbf16>, vector<2x8x8xf32> -> vector<2x8x8xf32>
    "tpu.trace_stop"() : () -> ()
    %cst_8 = arith.constant dense<0xFF800000> : vector<2x8xf32>
    %10 = vector.multi_reduction <maximumf>, %9, %cst_8 [2] : vector<2x8x8xf32> to vector<2x8xf32>
    %11 = vector.shape_cast %10 : vector<2x8xf32> to vector<2x8x1xf32>
    %12 = vector.broadcast %11 : vector<2x8x1xf32> to vector<2x8x8xf32>
    %13 = arith.subf %9, %12 : vector<2x8x8xf32>
    %14 = math.exp %13 : vector<2x8x8xf32>
    %cst_9 = arith.constant dense<0.000000e+00> : vector<2x8xf32>
    %15 = vector.multi_reduction <add>, %14, %cst_9 [2] : vector<2x8x8xf32> to vector<2x8xf32>
    %16 = vector.shape_cast %15 : vector<2x8xf32> to vector<2x8x1xf32>
    %17 = tpu.reciprocal %16 {approx = true} : vector<2x8x1xf32> -> vector<2x8x1xf32>
    %18 = vector.broadcast %17 : vector<2x8x1xf32> to vector<2x8x8xf32>
    %19 = arith.mulf %14, %18 : vector<2x8x8xf32>
    %20 = arith.truncf %19 : vector<2x8x8xf32> to vector<2x8x8xbf16>
    "tpu.trace_start"() <{level = 10 : i32, message = "hqk,hkd->hqd"}> : () -> ()
    %cst_10 = arith.constant dense<0.000000e+00> : vector<2x8x16xf32>
    %21 = tpu.matmul %20, %8, %cst_10 {dimension_numbers = #tpu.dot_dimension_numbers<[2], [1], [1], [2], [0, 0, 0, 1, 1, 2], [0], [0]>} : vector<2x8x8xbf16>, vector<2x8x16xbf16>, vector<2x8x16xf32> -> vector<2x8x16xf32>
    "tpu.trace_stop"() : () -> ()
    %22 = vector.extract_strided_slice %21 {offsets = [0, 0, 0], sizes = [1, 8, 16], strides = [1, 1, 1]} : vector<2x8x16xf32> to vector<1x8x16xf32>
    %23 = vector.shape_cast %22 : vector<1x8x16xf32> to vector<8x16xf32>
    %24 = arith.truncf %23 : vector<8x16xf32> to vector<8x16xbf16>
    %c0_11 = arith.constant 0 : index
    %c0_12 = arith.constant 0 : index
    %c0_13 = arith.constant 0 : index
    %25 = vector.load %arg7[%c0_11, %c0_12, %c0_13] : memref<2x16x32xbf16, #tpu.memory_space<vmem>>, vector<1x16x32xbf16>
    %26 = vector.shape_cast %25 : vector<1x16x32xbf16> to vector<16x32xbf16>
    %cst_14 = arith.constant dense<0.000000e+00> : vector<8x32xf32>
    %27 = tpu.matmul %24, %26, %cst_14 {dimension_numbers = #tpu.dot_dimension_numbers<[1], [0], [0], [1], [0, 0, 1, 1], [], []>} : vector<8x16xbf16>, vector<16x32xbf16>, vector<8x32xf32> -> vector<8x32xf32>
    %28 = vector.extract_strided_slice %21 {offsets = [1, 0, 0], sizes = [1, 8, 16], strides = [1, 1, 1]} : vector<2x8x16xf32> to vector<1x8x16xf32>
    %29 = vector.shape_cast %28 : vector<1x8x16xf32> to vector<8x16xf32>
    %30 = arith.truncf %29 : vector<8x16xf32> to vector<8x16xbf16>
    %c1 = arith.constant 1 : index
    %c0_15 = arith.constant 0 : index
    %c0_16 = arith.constant 0 : index
    %31 = vector.load %arg7[%c1, %c0_15, %c0_16] : memref<2x16x32xbf16, #tpu.memory_space<vmem>>, vector<1x16x32xbf16>
    %32 = vector.shape_cast %31 : vector<1x16x32xbf16> to vector<16x32xbf16>
    %cst_17 = arith.constant dense<0.000000e+00> : vector<8x32xf32>
    %33 = tpu.matmul %30, %32, %cst_17 {dimension_numbers = #tpu.dot_dimension_numbers<[1], [0], [0], [1], [0, 0, 1, 1], [], []>} : vector<8x16xbf16>, vector<16x32xbf16>, vector<8x32xf32> -> vector<8x32xf32>
    %34 = arith.addf %27, %33 : vector<8x32xf32>
    %c0_18 = arith.constant 0 : index
    %c0_19 = arith.constant 0 : index
    %35 = vector.load %arg8[%c0_18, %c0_19] : memref<1x32xf32, #tpu.memory_space<vmem>>, vector<1x32xf32>
    %36 = vector.shape_cast %35 : vector<1x32xf32> to vector<32xf32>
    %37 = vector.shape_cast %36 : vector<32xf32> to vector<1x32xf32>
    %38 = vector.broadcast %37 : vector<1x32xf32> to vector<8x32xf32>
    %39 = arith.addf %34, %38 : vector<8x32xf32>
    %c0_20 = arith.constant 0 : index
    %c0_21 = arith.constant 0 : index
    %c0_22 = arith.constant 0 : index
    %40 = vector.load %arg9[%c0_20, %c0_21, %c0_22] : memref<1x8x32xf32, #tpu.memory_space<vmem>>, vector<1x8x32xf32>
    %41 = vector.shape_cast %40 : vector<1x8x32xf32> to vector<8x32xf32>
    %42 = vector.shape_cast %39 : vector<8x32xf32> to vector<1x8x32xf32>
    tpu.vector_store %arg9[%c0_20, %c0_21, %c0_22], %42 {strides = array<i32>} : memref<1x8x32xf32, #tpu.memory_space<vmem>>, vector<1x8x32xf32>,
    return
  }
  func.func @transform_0(%arg0: i32, %arg1: i32) -> (i32, i32, i32) {
    %c0_i32 = arith.constant 0 : i32
    %c0_i32_0 = arith.constant 0 : i32
    %c0_i32_1 = arith.constant 0 : i32
    return %arg0, %c0_i32, %c0_i32_0 : i32, i32, i32
  }
  func.func @transform_1(%arg0: i32, %arg1: i32) -> (i32, i32) {
    %c0_i32 = arith.constant 0 : i32
    %c0_i32_0 = arith.constant 0 : i32
    %c0_i32_1 = arith.constant 0 : i32
    return %c0_i32, %c0_i32_0 : i32, i32
  }
  func.func @transform_2(%arg0: i32, %arg1: i32) -> (i32, i32) {
    %c0_i32 = arith.constant 0 : i32
    %c0_i32_0 = arith.constant 0 : i32
    %c0_i32_1 = arith.constant 0 : i32
    return %c0_i32, %c0_i32_0 : i32, i32
  }
  func.func @transform_3(%arg0: i32, %arg1: i32) -> (i32, i32) {
    %c0_i32 = arith.constant 0 : i32
    %c0_i32_0 = arith.constant 0 : i32
    %c0_i32_1 = arith.constant 0 : i32
    return %c0_i32, %c0_i32_0 : i32, i32
  }
  func.func @transform_4(%arg0: i32, %arg1: i32) -> (i32, i32) {
    %c0_i32 = arith.constant 0 : i32
    %c0_i32_0 = arith.constant 0 : i32
    %c0_i32_1 = arith.constant 0 : i32
    return %c0_i32, %c0_i32_0 : i32, i32
  }
  func.func @transform_5(%arg0: i32, %arg1: i32) -> (i32, i32, i32) {
    %c0_i32 = arith.constant 0 : i32
    %c0_i32_0 = arith.constant 0 : i32
    %c0_i32_1 = arith.constant 0 : i32
    %c0_i32_2 = arith.constant 0 : i32
    return %c0_i32, %c0_i32_0, %c0_i32_1 : i32, i32, i32
  }
  func.func @transform_6(%arg0: i32, %arg1: i32) -> (i32, i32) {
    %c0_i32 = arith.constant 0 : i32
    %c0_i32_0 = arith.constant 0 : i32
    %c0_i32_1 = arith.constant 0 : i32
    return %c0_i32, %c0_i32_0 : i32, i32
  }
  func.func @transform_7(%arg0: i32, %arg1: i32) -> (i32, i32, i32) {
    %c0_i32 = arith.constant 0 : i32
    %c0_i32_0 = arith.constant 0 : i32
    return %arg0, %arg1, %c0_i32 : i32, i32, i32
  }
}

</mosaic_0001>

<bundles_post_ra>
// kernel: tpu_custom_call.1
= control target key start
LH: loop header
LB: loop body
LE: loop exit
PB: predicated region body
PF: predicated region fallthrough
CT: control target
= control target key end

     0   :  { %s1994_s0 = inlined_call_operand.hbm [shape: f32[2,8,32], index: 0, kind: input, shape index: {}]   ;;  %s1995_s1 = inlined_call_operand.hbm [shape: f32[1,32], index: 1, kind: input, shape index: {}]   ;;  %s1996_s2 = inlined_call_operand.hbm [shape: f32[1,32], index: 2, kind: input, shape index: {}]   ;;  %s1997_s3 = inlined_call_operand.hbm [shape: bf16[32,96], index: 3, kind: input, shape index: {}]   ;;  %s1998_s4 = inlined_call_operand.hbm [shape: f32[1,96], index: 4, kind: input, shape index: {}]   ;;  %s1999_s5 = inlined_call_operand.hbm [shape: bf16[2,16,32], index: 5, kind: input, shape index: {}]   ;;  %s2000_s6 = inlined_call_operand.hbm [shape: f32[1,32], index: 6, kind: input, shape index: {}]   ;;  %s2001_s7 = inlined_call_operand.hbm [shape: f32[2,8,32], index: 7, kind: output, shape index: {}]  }
   0x1   :  { %2007 = sst [smem:[#allocation23_spill]] %s1995_s1 }
   0x2   :  { %2008 = sst [smem:[#allocation24_spill]] %s1997_s3 }
   0x3   :  { %12 = vsyncpa [#allocation6], 0 }
   0x4   :  { %14 = vsyncpa [#allocation6 + $0x1], 0 }
   0x5   :  { %15 = vsyncpa [#allocation9], 0 }
   0x6   :  { %16 = vsyncpa [#allocation12], 0 }
   0x7   :  { %17 = vsyncpa [#allocation15], 0 }
   0x8   :  { %18 = vsyncpa [#allocation7], 0 }
   0x9   :  { %20 = vsyncpa [#allocation7 + $0x1], 0  ;;  %s1608_s24 = smov 0   ;;  %s1610_s25 = smov 0  }
   0xa   :  { %s1612_s26 = smov 0   ;;  %s1614_s27 = smov 0  }
   0xb   :  { %s1616_s28 = smov 0   ;;  %s1618_s29 = smov 0  }
   0xc LB: > { %s2005_s30 = sadd.s32 4294967295, %s1549_s29   ;;  %p1012_p0 = scmp.ge.s32.totalorder %s1549_s29, 1  ;;  %s1549_s29 = sphi %s1618_s29, %s26_s29   ;;  %s1545_s28 = sphi %s1616_s28, %s2031_s28   ;;  %s1541_s27 = sphi %s1614_s27, %s2030_s27   ;;  %s1537_s26 = sphi %s1612_s26, %s2029_s26   ;;  %s1533_s25 = sphi %s1610_s25, %s2028_s25   ;;  %s1529_s24 = sphi %s1608_s24, %s2027_s24  }
   0xd   : > { %p1642_p1 = scmp.eq.s32.totalorder %s2005_s30, 0  ;;  %p223_p2 = scmp.lt.s32.totalorder %s1549_s29, 3 }
   0xe   : > { %s1551_s10 = smov [#allocation8]   ;;  %s1552_s12 = smov [#allocation11]  }
   0xf   : > { %s2009_s8 = scalar_select %p1642_p1, 1, 0 }
  0x10   : > { %p1647_p3 = pnand %p1012_p0, %p223_p2  ;;  %s236_s11 = sshll.u32 %s1551_s10, 4  ;;  %s237_s11 = int_to_ptr.vmem [resolvable:$true] %s236_s11 }
  0x11   : > { %s257_s13 = sshll.u32 %s1552_s12, 4  ;;  %s1553_s15 = smov [#allocation14]   ;;  %s1660_s13 = int_to_ptr.vmem [resolvable:$true] %s257_s13 }
  0x12   : > { %s2010_s9 = scalar_select %p1647_p3, 1, 0 }
  0x13   : > { %p1139_p5 = pneg %p1647_p3  ;;  %s1662_s16 = sshll.u32 %s1553_s15, 4  ;;  %s282_s16 = int_to_ptr.vmem [resolvable:$true] %s1662_s16 }
  0x14   : > { %s2012_s1 = sld [smem:[#allocation23_spill]] }
  0x15   : > { %p1656_p6 = pnand %p1139_p5, %p1642_p1 }
  0x17   : > { %p1672_p8 = pneg %p1656_p6 }
  0x1a   : > { %s1257_s19 = scalar_lea.hbm %s2012_s1, 16 }
  0x1b   : > { %p1258_p7 = scmp.ne.s32.totalorder %s2012_s1, %s1257_s19  ;;  %p1264_p11 = scmp.lt.u32.totalorder %s1257_s19, %s2012_s1 }
  0x1d   : > { %p1260_p9 = pnand %p1672_p8, %p1258_p7 }
  0x1f   : > { %p1261_p10 = pneg %p1260_p9 }
  0x21   : > { %p1266_p12 = pnand %p1264_p11, %p1261_p10 }
  0x23   : > { %1269 = shalt.err (!%p1266_p12)
}
  0x24   : > { %s1270_s12 = scalar_lea.vmem %s237_s11, 16  ;;  %s1277_s15 = scalar_lea.vmem %s237_s11, 32 }
  0x25   : > { %p1271_p13 = scmp.ne.s32.totalorder %s237_s11, %s1270_s12  ;;  %p1278_p5 = scmp.lt.s32.totalorder %s237_s11, %s237_s11 }
  0x26   : > { %p1279_p4 = scmp.lt.s32.totalorder %s1277_s15, %s1270_s12 }
  0x27   : > { %p1273_p0 = pnand %p1271_p13, %p1672_p8 }
  0x28   : > { %p1280_p3 = por %p1279_p4, %p1278_p5 }
  0x29   : > { %p1274_p2 = pneg %p1273_p0 }
  0x2b   : > { %p1281_p1 = pnand %p1280_p3, %p1274_p2 }
  0x2d   : > { %1284 = shalt.err (!%p1281_p1)
}
  0x2e   : > { %1142 = dma.hbm_to_vmem [thread:$0]  (!%p1656_p6), %s2012_s1, 16, %s237_s11, [#allocation9]  }
  0x2f   : > { %s2014_s3 = sld [smem:[#allocation24_spill]] }
  0x35   : > { %s1285_s21 = scalar_lea.hbm %s2014_s3, 256 }
  0x36   : > { %p1286_p7 = scmp.ne.s32.totalorder %s2014_s3, %s1285_s21  ;;  %p1292_p1 = scmp.lt.u32.totalorder %s1285_s21, %s2014_s3 }
  0x38   : > { %p1288_p9 = pnand %p1286_p7, %p1672_p8 }
  0x3a   : > { %p1289_p4 = pneg %p1288_p9 }
  0x3c   : > { %p1294_p3 = pnand %p1292_p1, %p1289_p4 }
  0x3e   : > { %1297 = shalt.err (!%p1294_p3)
}
  0x3f   : > { %s1298_s11 = scalar_lea.vmem %s1660_s13, 256  ;;  %p1306_p13 = scmp.lt.s32.totalorder %s1660_s13, %s1660_s13 }
  0x40   : > { %p1299_p10 = scmp.ne.s32.totalorder %s1660_s13, %s1298_s11  ;;  %p1307_p0 = scmp.lt.s32.totalorder %s1298_s11, %s1298_s11 }
  0x42   : > { %p1301_p11 = pnand %p1299_p10, %p1672_p8  ;;  %p1308_p2 = por %p1307_p0, %p1306_p13 }
  0x44   : > { %p1302_p12 = pneg %p1301_p11 }
  0x46   : > { %p1309_p5 = pnand %p1308_p2, %p1302_p12 }
  0x48   : > { %1312 = shalt.err (!%p1309_p5)
}
  0x49   : > { %s1554_s17 = smov 64   ;;  %s1555_s18 = smov 4  }
  0x4a   : > { %1148 = dma.hbm_to_vmem [thread:$0]  (!%p1656_p6), %s2014_s3, 256, %s1660_s13, [#allocation12], %s1554_s17, %s1554_s17, %s1555_s18  }
  0x4b   : > { %s1313_s10 = scalar_lea.hbm %s1999_s5, 256 }
  0x4c   : > { %p1314_p7 = scmp.ne.s32.totalorder %s1999_s5, %s1313_s10  ;;  %p1320_p1 = scmp.lt.u32.totalorder %s1313_s10, %s1999_s5 }
  0x4e   : > { %p1316_p9 = pnand %p1314_p7, %p1672_p8 }
  0x50   : > { %p1317_p4 = pneg %p1316_p9 }
  0x52   : > { %p1322_p3 = pnand %p1320_p1, %p1317_p4 }
  0x54   : > { %1325 = shalt.err (!%p1322_p3)
}
  0x55   : > { %s1326_s19 = scalar_lea.vmem %s282_s16, 256  ;;  %p1334_p13 = scmp.lt.s32.totalorder %s282_s16, %s282_s16 }
  0x56   : > { %p1327_p10 = scmp.ne.s32.totalorder %s282_s16, %s1326_s19  ;;  %p1335_p0 = scmp.lt.s32.totalorder %s1326_s19, %s1326_s19 }
  0x58   : > { %p1329_p11 = pnand %p1327_p10, %p1672_p8  ;;  %p1336_p2 = por %p1335_p0, %p1334_p13 }
  0x5a   : > { %p1330_p12 = pneg %p1329_p11 }
  0x5c   : > { %p1337_p5 = pnand %p1336_p2, %p1330_p12 }
  0x5e   : > { %1340 = shalt.err (!%p1337_p5)
}
  0x5f   : > { %1154 = dma.hbm_to_vmem [thread:$0]  (!%p1656_p6), %s1999_s5, 256, %s282_s16, [#allocation15], %s1554_s17, %s1554_s17, %s1555_s18  }
  0x60   : > { %s1556_s30 = smov [#allocation10]   ;;  %s1557_s23 = smov [#allocation13]  }
  0x61   : > { %s247_s21 = sshll.u32 %s1556_s30, 4  ;;  %s271_s10 = sshll.u32 %s1557_s23, 4  ;;  %s248_s21 = int_to_ptr.vmem [resolvable:$true] %s247_s21  ;;  %s272_s10 = int_to_ptr.vmem [resolvable:$true] %s271_s10 }
  0x62   : > { %s1341_s11 = scalar_lea.hbm %s1996_s2, 16 }
  0x63   : > { %p1342_p7 = scmp.ne.s32.totalorder %s1996_s2, %s1341_s11  ;;  %p1348_p1 = scmp.lt.u32.totalorder %s1341_s11, %s1996_s2 }
  0x65   : > { %p1344_p9 = pnand %p1342_p7, %p1672_p8 }
  0x67   : > { %p1345_p4 = pneg %p1344_p9 }
  0x69   : > { %p1350_p3 = pnand %p1348_p1, %p1345_p4 }
  0x6b   : > { %1353 = shalt.err (!%p1350_p3)
}
  0x6c   : > { %s1354_s16 = scalar_lea.vmem %s248_s21, 16  ;;  %s1361_s17 = scalar_lea.vmem %s248_s21, 32 }
  0x6d   : > { %p1355_p10 = scmp.ne.s32.totalorder %s248_s21, %s1354_s16  ;;  %p1362_p13 = scmp.lt.s32.totalorder %s248_s21, %s248_s21 }
  0x6e   : > { %p1363_p0 = scmp.lt.s32.totalorder %s1361_s17, %s1354_s16 }
  0x6f   : > { %p1357_p11 = pnand %p1355_p10, %p1672_p8 }
  0x70   : > { %p1364_p2 = por %p1363_p0, %p1362_p13 }
  0x71   : > { %p1358_p12 = pneg %p1357_p11 }
  0x73   : > { %p1365_p5 = pnand %p1364_p2, %p1358_p12 }
  0x75   : > { %1368 = shalt.err (!%p1365_p5)
}
  0x76   : > { %1145 = dma.hbm_to_vmem [thread:$0]  (!%p1656_p6), %s1996_s2, 16, %s248_s21, [#allocation9]  }
  0x77   : > { %s1369_s30 = scalar_lea.hbm %s1998_s4, 16 }
  0x78   : > { %p1370_p7 = scmp.ne.s32.totalorder %s1998_s4, %s1369_s30  ;;  %p1376_p1 = scmp.lt.u32.totalorder %s1369_s30, %s1998_s4 }
  0x7a   : > { %p1372_p9 = pnand %p1370_p7, %p1672_p8 }
  0x7c   : > { %p1373_p4 = pneg %p1372_p9 }
  0x7e   : > { %p1378_p3 = pnand %p1376_p1, %p1373_p4 }
  0x80   : > { %1381 = shalt.err (!%p1378_p3)
}
  0x81   : > { %s1382_s19 = scalar_lea.vmem %s272_s10, 16  ;;  %s1389_s21 = scalar_lea.vmem %s272_s10, 32 }
  0x82   : > { %p1383_p10 = scmp.ne.s32.totalorder %s272_s10, %s1382_s19  ;;  %p1390_p13 = scmp.lt.s32.totalorder %s272_s10, %s272_s10 }
  0x83   : > { %p1391_p0 = scmp.lt.s32.totalorder %s1389_s21, %s1382_s19 }
  0x84   : > { %p1385_p11 = pnand %p1383_p10, %p1672_p8 }
  0x85   : > { %p1392_p2 = por %p1391_p0, %p1390_p13 }
  0x86   : > { %p1386_p12 = pneg %p1385_p11 }
  0x88   : > { %p1393_p5 = pnand %p1392_p2, %p1386_p12 }
  0x8a   : > { %1396 = shalt.err (!%p1393_p5)
}
  0x8b   : > { %1151 = dma.hbm_to_vmem [thread:$0]  (!%p1656_p6), %s1998_s4, 16, %s272_s10, [#allocation12]  }
  0x8c   : > { %s1558_s17 = smov [#allocation16]   ;;  %s1397_s20 = scalar_lea.hbm %s2000_s6, 16 }
  0x8d   : > { %s295_s1 = sshll.u32 %s1558_s17, 4  ;;  %p1398_p7 = scmp.ne.s32.totalorder %s2000_s6, %s1397_s20  ;;  %s296_s1 = int_to_ptr.vmem [resolvable:$true] %s295_s1 }
  0x8e   : > { %p1404_p1 = scmp.lt.u32.totalorder %s1397_s20, %s2000_s6 }
  0x8f   : > { %p1400_p9 = pnand %p1398_p7, %p1672_p8 }
  0x91   : > { %p1401_p4 = pneg %p1400_p9 }
  0x93   : > { %p1406_p3 = pnand %p1404_p1, %p1401_p4 }
  0x95   : > { %1409 = shalt.err (!%p1406_p3)
}
  0x96   : > { %s1410_s10 = scalar_lea.vmem %s296_s1, 16  ;;  %s1417_s11 = scalar_lea.vmem %s296_s1, 32 }
  0x97   : > { %p1411_p10 = scmp.ne.s32.totalorder %s296_s1, %s1410_s10  ;;  %p1418_p13 = scmp.lt.s32.totalorder %s296_s1, %s296_s1 }
  0x98   : > { %p1419_p0 = scmp.lt.s32.totalorder %s1417_s11, %s1410_s10 }
  0x99   : > { %p1413_p11 = pnand %p1411_p10, %p1672_p8 }
  0x9a   : > { %p1420_p2 = por %p1419_p0, %p1418_p13 }
  0x9b   : > { %p1414_p12 = pneg %p1413_p11 }
  0x9d   : > { %p1421_p5 = pnand %p1420_p2, %p1414_p12 }
  0x9f   : > { %1424 = shalt.err (!%p1421_p5)
}
  0xa0   : > { %1157 = dma.hbm_to_vmem [thread:$0]  (!%p1656_p6), %s2000_s6, 16, %s296_s1, [#allocation15]  }
  0xa1   : > { %s1011_s22 = sadd.s32 4294967294, %s1549_s29   ;;  %s38_s13 = sadd.s32 1, %s1545_s28 }
  0xa2   : > { %p40_p8 = scmp.ge.s32.totalorder %s38_s13, 2  ;;  %s45_s14 = sadd.s32 1, %s1537_s26 }
  0xa3   : > { %p52_p7 = scmp.ne.s32.totalorder %s1537_s26, %s1533_s25  ;;  %p53_p9 = scmp.eq.s32.totalorder %s1549_s29, 0 }
  0xa4   : > { %s2033_s13 = smov (%p40_p8, %s38_s13), 0  ;;  %p58_p1 = scmp.ne.s32.totalorder %s1533_s25, %s1529_s24 }
  0xa5   : > { %p1792_p4 = por %p53_p9, %p52_p7  ;;  %s42_s17 = ssub.s32 %s1545_s28, %s2033_s13 }
  0xa6   : > { %s2016_s1 = sadd.s32 4294967295, %s1549_s29   ;;  %p43_p3 = scmp.eq.s32.totalorder %s42_s17, 0 }
  0xa7   : > { %p210_p6 = scmp.eq.s32.totalorder %s2016_s1, 1  ;;  %p2017_p10 = scmp.ne.s32.totalorder %s2009_s8, 0 }
  0xa8   : > { %p216_p13 = scmp.eq.s32.totalorder %s1011_s22, 1  ;;  %p1172_p2 = scmp.lt.s32.totalorder %s1549_s29, 2 }
  0xa9   : > { %p1804_p11 = por %p2017_p10, %p58_p1  ;;  %p1808_p12 = por %p210_p6, %p52_p7 }
  0xaa   : > { %s1813_s20 = scalar_select %p43_p3, %s1537_s26, %s45_s14  }
  0xab   : > { %s2019_s3 = scalar_select %p1808_p12, 1, 0 }
  0xac   : > { %p1815_p0 = por %p216_p13, %p58_p1  ;;  %s306_s23 = sand.u32 1, %s1537_s26  }
  0xad   : > { %s1021_s12 = sshll.u32 %s1545_s28, 7  ;;  %s1020_s15 = sshll.u32 %s306_s23, 3 }
  0xae   : > { %s2020_s30 = scalar_select %p1815_p0, 1, 0 }
  0xaf   : > { %s1825_s19 = scalar_lea.hbm %s1994_s0, %s1021_s12  ;;  %s310_s21 = scalar_lea.vmem [#allocation5], %s1020_s15 }
  0xb0   : > { %s317_s22 = sshll.u32 %s310_s21, 4  ;;  %p1829_p5 = pnand %p1172_p2, %p1792_p4  ;;  %s1833_s22 = int_to_ptr.vmem [resolvable:$true] %s317_s22 }
  0xb1   : > { %s307_s17 = scalar_lea.sflag [#allocation6], %s306_s23  ;;  %s1425_s1 = scalar_lea.hbm %s1825_s19, 128 }
  0xb2   : > { %p1426_p8 = scmp.ne.s32.totalorder %s1825_s19, %s1425_s1  ;;  %p1427_p7 = pneg %p1829_p5 }
  0xb3   : > { %s1430_s16 = scalar_lea.hbm %s1994_s0, 256  ;;  %p1431_p4 = scmp.lt.u32.totalorder %s1825_s19, %s1994_s0 }
  0xb4   : > { %p1428_p9 = pnand %p1427_p7, %p1426_p8  ;;  %p1432_p6 = scmp.lt.u32.totalorder %s1430_s16, %s1425_s1 }
  0xb5   : > { %p1434_p10 = scmp.lt.u32.totalorder %s1425_s1, %s1825_s19 }
  0xb6   : > { %p1429_p1 = pneg %p1428_p9  ;;  %p1433_p3 = por %p1432_p6, %p1431_p4 }
  0xb8   : > { %p1435_p13 = por %p1434_p10, %p1433_p3 }
  0xba   : > { %p1436_p2 = pnand %p1435_p13, %p1429_p1 }
  0xbc   : > { %1439 = shalt.err (!%p1436_p2)
}
  0xbd   : > { %s1440_s23 = scalar_lea.vmem %s1833_s22, 128  ;;  %s1559_s21 = smov [#allocation5]  }
  0xbe   : > { %p1441_p8 = scmp.ne.s32.totalorder %s1833_s22, %s1440_s23  ;;  %s1445_s12 = sshll.u32 %s1559_s21, 4  ;;  %s1446_s12 = int_to_ptr.vmem [resolvable:$false] %s1445_s12 }
  0xbf   : > { %s1447_s15 = scalar_lea.vmem %s1446_s12, 256  ;;  %p1448_p12 = scmp.lt.s32.totalorder %s1833_s22, %s1446_s12 }
  0xc0   : > { %p1443_p9 = pnand %p1441_p8, %p1427_p7  ;;  %p1449_p4 = scmp.lt.s32.totalorder %s1447_s15, %s1440_s23 }
  0xc2   : > { %p1444_p0 = pneg %p1443_p9  ;;  %p1450_p6 = por %p1449_p4, %p1448_p12 }
  0xc4   : > { %p1451_p3 = pnand %p1450_p6, %p1444_p0 }
  0xc6   : > { %1454 = shalt.err (!%p1451_p3)
}
  0xc7   : > { %1161 = dma.hbm_to_vmem [thread:$0]  (!%p1829_p5), %s1825_s19, 128, %s1833_s22, %s307_s17  }
  0xc8   : > { %p2022_p1 = scmp.ne.s32.totalorder %s2010_s9, 0 }
  0xc9   : > { %s1863_s1 = sand.u32 (!%p2022_p1), 1, %s1533_s25  }
  0xca   : > { %326 = sbr.rel (%p2022_p1) target bundleno = 1857 (0x741), region = 48  ;;  %s1023_s16 = sshll.u32 (!%p2022_p1), %s1863_s1, 3 }
  0xcb   : > { %s329_s10 = scalar_lea.sflag (!%p2022_p1), [#allocation6], %s1863_s1  ;;  %s332_s11 = scalar_lea.vmem (!%p2022_p1), [#allocation5], %s1023_s16 }
  0xd1   : > { %1508 = dma.done.wait (%p1804_p11), %s329_s10, 128  }
  0xd2   : > { %1510 = vsyncadd (%p1804_p11), %s329_s10, 4294967168  ;;  %p2023_p12 = scmp.ne.s32.totalorder %s2009_s8, 0 }
  0xd4   : > { %1512 = dma.done.wait (%p2023_p12), [#allocation9], 32  }
  0xd5   : > { %1514 = vsyncadd (%p2023_p12), [#allocation9], 4294967264 }
  0xd6   : > { %1516 = dma.done.wait (%p2023_p12), [#allocation12], 272  }
  0xd7   : > { %1518 = vsyncadd (%p2023_p12), [#allocation12], 4294967024 }
  0xd8   : > { %1520 = dma.done.wait (%p2023_p12), [#allocation15], 272  }
  0xd9   : > { %1522 = vsyncadd (%p2023_p12), [#allocation15], 4294967024  ;;  %vm393_vm0 = vcmask 261120   ;;  %v392_v0 = vld [vmem:[%s332_s11] sm:$0xff]  ;;  %v1243_v7 = vld [vmem:[#allocation11] sm:$0xff]   ;;  %v1560_v8 = vmov 0.0  }
  0xda   : > { %v394_v1 = vsel %vm393_vm0, %v392_v0, 0.0  ;;  %1067 = vmatprep.subr.bf16.mxu0 %v1560_v8  ;;  %vm1561_vm1 = vmmov 0   ;;  %v1244_v9 = vld [vmem:[#allocation11 + $0x8] sm:$0xff]   ;;  %1075 = vmatprep.subr.bf16.mxu1 %v1560_v8  ;;  %v1031_v14 = vld [vmem:[#allocation8] ss:$0 sm:$0xff]  ;;  %vm492_vm2 = vcmask 125952  }
  0xdb   : > { %395 = vadd.xlane.f32.xlu0 %v394_v1  ;;  %1071 = vmatprep.mubr.msk.bf16.mxu0 %vm1561_vm1, %v1560_v8  ;;  %v1032_v16 = vld [vmem:[#allocation10] ss:$0 sm:$0xff]  ;;  %v1033_v20 = vld [vmem:[#allocation13] ss:$0 sm:$0xff]  ;;  %s1562_s8 = smov 112   ;;  %s1563_s9 = smov 96  }
  0xdc   : > { %1068 = vmatpush3.bf16.msra.mxu0 %v1243_v7  ;;  %1077 = vmatprep.mubr.msk.bf16.mxu1 %vm1561_vm1, %v1560_v8  ;;  %s1564_s18 = smov 80   ;;  %vm531_vm3 = vcmask 130048   ;;  %vm624_vm4 = vcmask 64512   ;;  %s1565_s19 = smov 48   ;;  %vm652_vm5 = vcmask 1043456   ;;  %v1246_v7 = vld [vmem:[#allocation14] sm:$0xff]  }
  0xdd   : > { %1069 = vmatprep.subr.bf16.mxu0 %v1560_v8  ;;  %s1566_s22 = smov 64   ;;  %s1048_s14 = sshll.u32 %s1541_s27, 7 }
  0xde   : > { %s386_s17 = scalar_lea.vmem [#allocation17], %s1023_s16  ;;  %s1944_s15 = scalar_lea.hbm %s2001_s7, %s1048_s14 }
  0xdf   : > { %s872_s23 = sshll.u32 %s386_s17, 4  ;;  %s858_s27 = scalar_lea.sflag [#allocation7], %s1863_s1  ;;  %s1946_s23 = int_to_ptr.vmem [resolvable:$true] %s872_s23 }
  0xe0   : > { %1070 = vmatpush3.bf16.msra.mxu0 %v1244_v9  ;;  %s1455_s16 = scalar_lea.vmem %s1946_s23, 128  ;;  %p2024_p0 = scmp.ne.s32.totalorder %s2019_s3, 0 }
  0xe1   : > { %1081 = vmatprep.subr.bf16.mxu0 %v1560_v8  ;;  %p1456_p11 = scmp.ne.s32.totalorder %s1946_s23, %s1455_s16  ;;  %s1567_s10 = smov [#allocation17]  }
  0xe2   : > { %s1459_s11 = sshll.u32 %s1567_s10, 4  ;;  %s1460_s11 = int_to_ptr.vmem [resolvable:$false] %s1459_s11 }
  0xe3   : > { %p1457_p5 = pnand %p1456_p11, %p2024_p0  ;;  %p1462_p10 = scmp.lt.s32.totalorder %s1946_s23, %s1460_s11 }
  0xe5   : > { %p1458_p7 = pneg %p1457_p5 }
 0x168   : > { %v396_v2 = vpop.xlane.xlu0 %395 }
 0x169   : > { %v398_v3 = vmul.f32 0.03125, %v396_v2 }
 0x16b   : > { %v399_v4 = vsub.f32 %v392_v0, %v398_v3 }
 0x16d   : > { %v400_v5 = vmul.f32 %v399_v4, %v399_v4 }
 0x16f   : > { %v401_v6 = vsel %vm393_vm0, %v400_v5, 0.0 }
 0x170   : > { %402 = vadd.xlane.f32.xlu0 %v401_v6  ;;  %v1245_v6 = vld [vmem:[#allocation14 + $0x8] sm:$0xff]  }
 0x1fd   : > { %v403_v10 = vpop.xlane.xlu0 %402 }
 0x1fe   : > { %v404_v11 = vmul.f32 0.03125, %v403_v10 }
 0x200   : > { %v405_v12 = vadd.f32 1e-05, %v404_v11 }
 0x202   : > { %1247 = vrsqrt.f32 %v405_v12 }
 0x20c   : > { %v1248_v13 = vpop.eup %1247 }
 0x20d   : > { %v407_v15 = vmul.f32 %v1248_v13, %v399_v4 }
 0x20f   : > { %v415_v17 = vmul.f32 %v1031_v14, %v407_v15 }
 0x211   : > { %v423_v18 = vadd.f32 %v1032_v16, %v415_v17 }
 0x213   : > { %v424_v19 = vpack.c.bf16 %v423_v18, %v423_v18 }
 0x215   : > { %1072 = vmatmul.mubr.msk.bf16.vlgmr.msra.gmra.mrb[0].mxu0 %vm393_vm0, %v424_v19 }
 0x216   : > { %1083 = vmatprep.mubr.msk.bf16.mxu0 %vm1561_vm1, %v1560_v8 }
 0x2e8   : > { %v485_v21 = vpop.f32.mrb[0].mxu0 }
 0x2e9   : > { %v486_v22 = vadd.f32 %v1033_v20, %v485_v21  ;;  %v1073_v23 = vpop.f32.mrb[1].mxu0  ;;  %v1046_v21 = vld [vmem:[#allocation16] ss:$0 sm:$0xff] }
 0x2ea   : > { %v488_v24 = vpop.f32.mrb[2].mxu0 }
 0x2eb   : > { %v1898_v25 = vpack.c.bf16 %v486_v22, %v486_v22  ;;  %v1074_v26 = vpop.f32.mrb[3].mxu0 }
 0x2ed   : > { %505 = vrot.lane.b32.xlu0 %v1898_v25, %s1562_s8  ;;  %497 = vrot.lane.b32.xlu1 %v1898_v25, %s1563_s9  ;;  %493 = vst.msk [vmem:[#allocation2] sm:$0xf] %vm492_vm2, %v1898_v25  ;;  %s1461_s8 = scalar_lea.vmem %s1460_s11, 256 }
 0x2ee   : > { %p1463_p13 = scmp.lt.s32.totalorder %s1461_s8, %s1455_s16 }
 0x2f0   : > { %p1464_p2 = por %p1463_p13, %p1462_p10 }
 0x2f1   : > { %510 = vrot.lane.b32.xlu1 %v1898_v25, %s1564_s18 }
 0x2f2   : > { %p1465_p8 = pnand %p1464_p2, %p1458_p7 }
 0x2f4   : > { %v525_v34 = vld [vmem:[#allocation2] sm:$0xf] }
 0x35f   : > { %v506_v27 = vpop.permute.xlu0 %505  ;;  %v498_v28 = vpop.permute.xlu1 %497 }
 0x360   : > { %509 = vst.msk [vmem:[#allocation2 + $0x4] sm:$0xf] %vm492_vm2, %v506_v27  ;;  %500 = vst.msk [vmem:[#allocation3] sm:$0xf] %vm492_vm2, %v498_v28 }
 0x363   : > { %v511_v29 = vpop.permute.xlu1 %510 }
 0x364   : > { %514 = vst.msk [vmem:[#allocation3 + $0x4] sm:$0xf] %vm492_vm2, %v511_v29 }
 0x367   : > { %v527_v30 = vld [vmem:[#allocation3] sm:$0xf]  ;;  %v526_v35 = vld [vmem:[#allocation2 + $0x4] sm:$0xf] }
 0x368   : > { %v536_v31 = vsel %vm531_vm3, %v527_v30, 0 }
 0x369   : > { %1076 = vmatpush3.bf16.xpose.msra.mxu1 %v536_v31 }
 0x36a   : > { %1087 = vmatprep.subr.bf16.mxu1 %v1560_v8 }
 0x36b   : > { %v528_v32 = vld [vmem:[#allocation3 + $0x4] sm:$0xf] }
 0x36c   : > { %v582_v33 = vsel %vm531_vm3, %v528_v32, 0 }
 0x36d   : > { %1082 = vmatpush3.bf16.xpose.msra.mxu0 %v582_v33 }
 0x36e   : > { %1093 = vmatprep.subr.bf16.mxu0 %v1560_v8 }
 0x370   : > { %1078 = vmatmul.mubr.msk.bf16.vlgmr.msra.gmra.mrb[0].mxu1 %vm531_vm3, %v525_v34 }
 0x371   : > { %1089 = vmatprep.mubr.msk.bf16.mxu1 %vm1561_vm1, %v1560_v8 }
 0x374   : > { %1084 = vmatmul.mubr.msk.bf16.vlgmr.msra.gmra.mrb[4].mxu0 %vm531_vm3, %v526_v35 }
 0x375   : > { %1095 = vmatprep.mubr.msk.bf16.mxu0 %vm1561_vm1, %v1560_v8 }
 0x443   : > { %v572_v36 = vpop.f32.mrb[0].mxu1 }
 0x444   : > { %v1079_v37 = vpop.f32.mrb[1].mxu1  ;;  %v625_v38 = vsel %vm624_vm4, %v572_v36, -inf }
 0x445   : > { %626 = vmax.xlane.f32.xlu1 %v625_v38  ;;  %v575_v39 = vpop.f32.mrb[2].mxu1 }
 0x446   : > { %v1080_v40 = vpop.f32.mrb[3].mxu1 }
 0x447   : > { %v618_v41 = vpop.f32.mrb[4].mxu0 }
 0x448   : > { %v1085_v42 = vpop.f32.mrb[5].mxu0  ;;  %v628_v43 = vsel %vm624_vm4, %v618_v41, -inf }
 0x449   : > { %629 = vmax.xlane.f32.xlu0 %v628_v43  ;;  %v621_v44 = vpop.f32.mrb[6].mxu0 }
 0x44a   : > { %v1086_v45 = vpop.f32.mrb[7].mxu0 }
 0x45f   : > { %515 = vrot.lane.b32.xlu0 %v1898_v25, %s1565_s19 }
 0x4d2   : > { %v627_v46 = vpop.xlane.xlu1 %626 }
 0x4d3   : > { %v631_v47 = vsub.f32 %v572_v36, %v627_v46 }
 0x4d5   : > { %v633_v48 = vmul.f32 1.442695, %v631_v47 }
 0x4d6   : > { %v630_v49 = vpop.xlane.xlu0 %629 }
 0x4d7   : > { %1249 = vpow2.f32 %v633_v48  ;;  %v632_v50 = vsub.f32 %v618_v41, %v630_v49 }
 0x4d9   : > { %v635_v51 = vmul.f32 1.442695, %v632_v50 }
 0x4da   : > { %v516_v52 = vpop.permute.xlu0 %515 }
 0x4db   : > { %1251 = vpow2.f32 %v635_v51  ;;  %519 = vst.msk [vmem:[#allocation4 + $0x4] sm:$0xf] %vm492_vm2, %v516_v52 }
 0x4e1   : > { %v1250_v53 = vpop.eup %1249 }
 0x4e2   : > { %v637_v54 = vsel %vm624_vm4, %v1250_v53, 0.0  ;;  %v530_v55 = vld [vmem:[#allocation4 + $0x4] sm:$0xf] }
 0x4e3   : > { %638 = vadd.xlane.f32.xlu1 %v637_v54  ;;  %v700_v56 = vsel %vm652_vm5, %v530_v55, 0 }
 0x4e4   : > { %1094 = vmatpush3.bf16.msra.mxu0 %v700_v56 }
 0x4e5   : > { %v1252_v57 = vpop.eup %1251  ;;  %1105 = vmatprep.subr.bf16.mxu0 %v1560_v8 }
 0x4e6   : > { %v640_v58 = vsel %vm624_vm4, %v1252_v57, 0.0 }
 0x4e7   : > { %641 = vadd.xlane.f32.xlu1 %v640_v58 }
 0x4f8   : > { %501 = vrot.lane.b32.xlu1 %v1898_v25, %s1566_s22 }
 0x570   : > { %v639_v59 = vpop.xlane.xlu1 %638 }
 0x571   : > { %1253 = vrcp.f32 %v639_v59 }
 0x574   : > { %v642_v60 = vpop.xlane.xlu1 %641 }
 0x575   : > { %1255 = vrcp.f32 %v642_v60 }
 0x578   : > { %v502_v61 = vpop.permute.xlu1 %501 }
 0x579   : > { %504 = vst.msk [vmem:[#allocation4] sm:$0xf] %vm492_vm2, %v502_v61 }
 0x57b   : > { %v1254_v62 = vpop.eup %1253 }
 0x57c   : > { %v645_v0 = vmul.f32 %v1254_v62, %v1250_v53 }
 0x57e   : > { %v647_v5 = vpack.c.bf16 %v645_v0, %v645_v0 }
 0x57f   : > { %v1256_v63 = vpop.eup %1255 }
 0x580   : > { %v646_v1 = vmul.f32 %v1256_v63, %v1252_v57  ;;  %v529_v2 = vld [vmem:[#allocation4] sm:$0xf] }
 0x581   : > { %v654_v3 = vsel %vm652_vm5, %v529_v2, 0 }
 0x582   : > { %1088 = vmatpush3.bf16.msra.mxu1 %v654_v3  ;;  %v648_v4 = vpack.c.bf16 %v646_v1, %v646_v1 }
 0x583   : > { %1099 = vmatprep.subr.bf16.mxu1 %v1560_v8 }
 0x584   : > { %1096 = vmatmul.mubr.msk.bf16.vlgmr.msra.gmra.mrb[8].mxu0 %vm624_vm4, %v648_v4 }
 0x585   : > { %1090 = vmatmul.mubr.msk.bf16.vlgmr.msra.gmra.mrb[4].mxu1 %vm624_vm4, %v647_v5  ;;  %1107 = vmatprep.mubr.msk.bf16.mxu0 %vm1561_vm1, %v1560_v8 }
 0x586   : > { %1101 = vmatprep.mubr.msk.bf16.mxu1 %vm1561_vm1, %v1560_v8  ;;  %1100 = vmatpush3.bf16.msra.mxu1 %v1245_v6 }
 0x587   : > { %1106 = vmatpush3.bf16.msra.mxu0 %v1246_v7 }
 0x657   : > { %v736_v9 = vpop.f32.mrb[8].mxu0 }
 0x658   : > { %v745_v10 = vpack.c.bf16 %v736_v9, %v736_v9  ;;  %v690_v11 = vpop.f32.mrb[4].mxu1  ;;  %v1097_v12 = vpop.f32.mrb[9].mxu0 }
 0x659   : > { %v742_v13 = vpack.c.bf16 %v690_v11, %v690_v11  ;;  %v1091_v14 = vpop.f32.mrb[5].mxu1  ;;  %v739_v15 = vpop.f32.mrb[10].mxu0 }
 0x65a   : > { %v693_v16 = vpop.f32.mrb[6].mxu1  ;;  %v1098_v17 = vpop.f32.mrb[11].mxu0  ;;  %1102 = vmatmul.mubr.msk.bf16.vlgmr.msra.gmra.mrb[8].mxu1 %vm531_vm3, %v745_v10 }
 0x65b   : > { %v1092_v18 = vpop.f32.mrb[7].mxu1  ;;  %1108 = vmatmul.mubr.msk.bf16.vlgmr.msra.gmra.mrb[12].mxu0 %vm531_vm3, %v742_v13 }
 0x72d   : > { %v792_v8 = vpop.f32.mrb[8].mxu1 }
 0x72e   : > { %v1103_v19 = vpop.f32.mrb[9].mxu1  ;;  %v841_v20 = vpop.f32.mrb[12].mxu0 }
 0x72f   : > { %v842_v22 = vadd.f32 %v841_v20, %v792_v8  ;;  %v795_v23 = vpop.f32.mrb[10].mxu1  ;;  %v1109_v24 = vpop.f32.mrb[13].mxu0 }
 0x730   : > { %v1104_v25 = vpop.f32.mrb[11].mxu1  ;;  %v844_v26 = vpop.f32.mrb[14].mxu0 }
 0x731   : > { %v854_v27 = vadd.f32 %v1046_v21, %v842_v22  ;;  %v1110_v28 = vpop.f32.mrb[15].mxu0 }
 0x733   : > { %856 = vst.msk [vmem:[%s386_s17] sm:$0xff] %vm393_vm0, %v854_v27 }
 0x734   : > { %1468 = shalt.err (!%p1465_p8)
}
 0x735   : > { %s1469_s1 = scalar_lea.hbm %s1944_s15, 128  ;;  %s1473_s19 = scalar_lea.hbm %s2001_s7, 256 }
 0x736   : > { %p1470_p9 = scmp.ne.s32.totalorder %s1944_s15, %s1469_s1  ;;  %p1474_p3 = scmp.lt.u32.totalorder %s1944_s15, %s2001_s7 }
 0x737   : > { %p1475_p1 = scmp.lt.u32.totalorder %s1473_s19, %s1469_s1  ;;  %p1477_p11 = scmp.lt.u32.totalorder %s1469_s1, %s1944_s15 }
 0x738   : > { %p1471_p4 = pnand %p1470_p9, %p2024_p0 }
 0x739   : > { %p1476_p12 = por %p1475_p1, %p1474_p3 }
 0x73a   : > { %p1472_p6 = pneg %p1471_p4 }
 0x73b   : > { %p1478_p5 = por %p1477_p11, %p1476_p12 }
 0x73d   : > { %p1479_p7 = pnand %p1478_p5, %p1472_p6 }
 0x73f   : > { %1482 = shalt.err (!%p1479_p7)
}
 0x740   : > { %1137 = dma.vmem_to_hbm [thread:$0]  (%p2024_p0), %s1946_s23, 128, %s1944_s15, %s858_s27  }
 0x741 PF: > { %s884_s17 = sand.u32 1, %s1529_s24   ;;  %p2025_p10 = scmp.ne.s32.totalorder %s2020_s30, 0 }
 0x742   : > { %p2026_p13 = scmp.ge.s32.totalorder %s1549_s29, 2  ;;  %s885_s21 = scalar_lea.sflag [#allocation7], %s884_s17 }
 0x744   : > { %p1163_p2 = pnand %p2026_p13, %p2025_p10 }
 0x746   : > { %1524 = dma.done.wait (!%p1163_p2), %s885_s21, 128  }
 0x747   : > { %1526 = vsyncadd (!%p1163_p2), %s885_s21, 4294967168  ;;  %s26_s29 = sadd.s32 1, %s1549_s29   ;;  %s2027_s24 = smov %s1533_s25 }
 0x748   : > { %p23_p8 = scmp.ge.s32.totalorder %s26_s29, 4   ;;  %s2028_s25 = smov %s1537_s26 }
 0x749   : > { %s2029_s26 = smov %s1813_s20  ;;  %s2030_s27 = smov %s1545_s28 }
 0x74a   : > { %s2031_s28 = smov %s2033_s13  ;;  %25 = sbr.rel (!%p23_p8) target bundleno = 12 (0xc), region = 126 }
 0x751   :  { %890 = vsyncpa [#allocation6], 1 }
 0x752   :  { %892 = vsyncpa [#allocation6 + $0x1], 1 }
 0x753   :  { %893 = vsyncpa [#allocation9], 1 }
 0x754   :  { %894 = vsyncpa [#allocation12], 1 }
 0x755   :  { %895 = vsyncpa [#allocation15], 1 }
 0x756   :  { %896 = vsyncpa [#allocation7], 1 }
 0x757   :  { %898 = vsyncpa [#allocation7 + $0x1], 1 }

</bundles_post_ra>
